<compile_context>
chip_gen: v5e
topology: v5e:2x2
jax: 0.10.0
libtpu: 0.0.40
codegen_flags: <defaults>
</compile_context>

<pallas_src>
import functools

import jax
import jax.numpy as jnp
from jax import lax
from jax.experimental import pallas as pl
from jax.experimental.pallas import tpu as pltpu

EPS = 1e-5


def _bottleneck_kernel(x_ref, w1_ref, b1_ref, w2_ref, b2_ref, w3_ref, b3_ref, o_ref,
                       *, ks, pad, P, L, stack_taps):
    x = x_ref[0].astype(jnp.float32)                                   # (Cin, L)

    # --- conv1 (1x1, BN1 folded) + ReLU ---
    h1 = jnp.dot(w1_ref[...], x.astype(jnp.bfloat16),
                 preferred_element_type=jnp.float32) + b1_ref[...]      # (P, L)
    h1 = jnp.maximum(h1, 0.0)

    # --- conv2 (kernel ks, pad, stride 1, BN2 folded) + ReLU ---
    # Shifted operands via XLU lane-rotates + iota edge masks (no concat padding,
    # no lane-misaligned slices).
    lane = lax.broadcasted_iota(jnp.int32, (P, L), 1)
    taps = []
    for k in range(ks):                                                 # unrolled at trace time
        d = k - pad                                                     # tap offset
        if d == 0:
            taps.append(h1)
        else:
            r = pltpu.roll(h1, shift=(-d) % L, axis=1)                  # r[:, l] = h1[:, l + d]
            mask = (lane >= -d) & (lane < L - d)                        # zero the wrapped lanes
            taps.append(jnp.where(mask, r, 0.0))

    if stack_taps:
        # One K = ks*P matmul instead of ks small-K matmuls.
        stacked = jnp.concatenate(taps, axis=0).astype(jnp.bfloat16)    # (ks*P, L)
        h2 = jnp.dot(w2_ref[...], stacked, preferred_element_type=jnp.float32)
    else:
        h2 = jnp.zeros((P, L), jnp.float32)
        for k in range(ks):
            h2 = h2 + jnp.dot(w2_ref[:, k * P:(k + 1) * P],
                              taps[k].astype(jnp.bfloat16),
                              preferred_element_type=jnp.float32)
    h2 = jnp.maximum(h2 + b2_ref[...], 0.0)                             # (P, L)

    # --- conv3 (1x1, BN3 folded) ---
    h3 = jnp.dot(w3_ref[...], h2.astype(jnp.bfloat16),
                 preferred_element_type=jnp.float32) + b3_ref[...]      # (Cout, L)

    # --- residual add (identity shortcut) + ReLU ---
    o_ref[0] = jnp.maximum(h3 + x, 0.0).astype(o_ref.dtype)


def bottleneck1d(x, params, *, ks=3, stride=1):
    """x: (N, inplanes, L) float32. params: conv weights + BN params (inference)."""
    # TODO(synk): conv2 stride>1 and the optional `downsample` sub-module (an arbitrary
    # nn.Module in the original) are not implemented; only the shape-consistent
    # identity-residual configuration (stride=1, downsample=None, inplanes==planes*4)
    # is supported.
    assert stride == 1, "only stride=1 (identity residual) is supported"
    N, Cin, L = x.shape
    w1, w2, w3 = params["w1"], params["w2"], params["w3"]   # (P,Cin,1), (P,P,ks), (Cout,P,1)
    P = w1.shape[0]
    Cout = w3.shape[0]
    assert Cout == Cin, "identity residual requires inplanes == planes * expansion"
    assert w2.shape[2] == ks
    pad = (ks - 1) // 2

    # Fold inference-mode BN into each conv: y = bn(conv(x)) = (s*W) conv x + (b - m*s).
    def fold(w, g, b, m, v):
        s = g / jnp.sqrt(v + EPS)
        return w * s[:, None, None], b - m * s

    w1f, b1f = fold(w1, params["g1"], params["b1"], params["m1"], params["v1"])
    w2f, b2f = fold(w2, params["g2"], params["b2"], params["m2"], params["v2"])
    w3f, b3f = fold(w3, params["g3"], params["b3"], params["m3"], params["v3"])

    # bf16 matmul operands (f32 accumulation in-kernel); biases stay f32.
    w1m = w1f[:, :, 0].astype(jnp.bfloat16)                                   # (P, Cin)
    w2m = jnp.transpose(w2f, (0, 2, 1)).reshape(P, ks * P).astype(jnp.bfloat16)  # (P, ks*P), tap-major
    w3m = w3f[:, :, 0].astype(jnp.bfloat16)                                   # (Cout, P)
    b1c = b1f.reshape(P, 1).astype(jnp.float32)
    b2c = b2f.reshape(P, 1).astype(jnp.float32)
    b3c = b3f.reshape(Cout, 1).astype(jnp.float32)

    stack_taps = (ks * P) <= 256   # stack taps into K only while K stays <= MXU depth

    kernel = functools.partial(_bottleneck_kernel, ks=ks, pad=pad, P=P, L=L,
                               stack_taps=stack_taps)

    return pl.pallas_call(
        kernel,
        out_shape=jax.ShapeDtypeStruct((N, Cout, L), x.dtype),
        grid=(N,),
        in_specs=[
            pl.BlockSpec((1, Cin, L), lambda n: (n, 0, 0)),
            pl.BlockSpec((P, Cin), lambda n: (0, 0)),
            pl.BlockSpec((P, 1), lambda n: (0, 0)),
            pl.BlockSpec((P, ks * P), lambda n: (0, 0)),
            pl.BlockSpec((P, 1), lambda n: (0, 0)),
            pl.BlockSpec((Cout, P), lambda n: (0, 0)),
            pl.BlockSpec((Cout, 1), lambda n: (0, 0)),
        ],
        out_specs=pl.BlockSpec((1, Cout, L), lambda n: (n, 0, 0)),
        compiler_params=pltpu.CompilerParams(
            dimension_semantics=("parallel",),
            vmem_limit_bytes=32 * 1024 * 1024,
        ),
    )(x, w1m, b1c, w2m, b2c, w3m, b3c)


def _reference(x, p, *, ks=3):
    """Pure-JAX f32 reference of the PyTorch forward (inference-mode BN)."""
    pad = (ks - 1) // 2
    dn = ("NCH", "OIH", "NCH")

    def bn(v, g, b, m, var):
        return ((v - m[None, :, None]) / jnp.sqrt(var[None, :, None] + EPS)
                * g[None, :, None] + b[None, :, None])

    h = lax.conv_general_dilated(x, p["w1"], (1,), [(0, 0)], dimension_numbers=dn)
    h = jax.nn.relu(bn(h, p["g1"], p["b1"], p["m1"], p["v1"]))
    h = lax.conv_general_dilated(h, p["w2"], (1,), [(pad, pad)], dimension_numbers=dn)
    h = jax.nn.relu(bn(h, p["g2"], p["b2"], p["m2"], p["v2"]))
    h = lax.conv_general_dilated(h, p["w3"], (1,), [(0, 0)], dimension_numbers=dn)
    h = bn(h, p["g3"], p["b3"], p["m3"], p["v3"])
    return jax.nn.relu(h + x)


if __name__ == "__main__":
    N, planes, L, ks = 2, 8, 128, 3
    inplanes = planes * 4          # identity residual requires inplanes == planes * expansion
    P, Cout = planes, planes * 4

    key = jax.random.PRNGKey(0)
    keys = jax.random.split(key, 16)

    params = {
        # conv weights (no bias, as in the PyTorch module)
        "w1": jax.random.normal(keys[0], (P, inplanes, 1), jnp.float32) * 0.1,
        "w2": jax.random.normal(keys[1], (P, P, ks), jnp.float32) * 0.1,
        "w3": jax.random.normal(keys[2], (Cout, P, 1), jnp.float32) * 0.1,
        # BN1 params / running stats (inference mode)
        "g1": 1.0 + 0.1 * jax.random.normal(keys[3], (P,), jnp.float32),
        "b1": 0.1 * jax.random.normal(keys[4], (P,), jnp.float32),
        "m1": 0.1 * jax.random.normal(keys[5], (P,), jnp.float32),
        "v1": jax.random.uniform(keys[6], (P,), jnp.float32, 0.5, 1.5),
        # BN2
        "g2": 1.0 + 0.1 * jax.random.normal(keys[7], (P,), jnp.float32),
        "b2": 0.1 * jax.random.normal(keys[8], (P,), jnp.float32),
        "m2": 0.1 * jax.random.normal(keys[9], (P,), jnp.float32),
        "v2": jax.random.uniform(keys[10], (P,), jnp.float32, 0.5, 1.5),
        # BN3
        "g3": 1.0 + 0.1 * jax.random.normal(keys[11], (Cout,), jnp.float32),
        "b3": 0.1 * jax.random.normal(keys[12], (Cout,), jnp.float32),
        "m3": 0.1 * jax.random.normal(keys[13], (Cout,), jnp.float32),
        "v3": jax.random.uniform(keys[14], (Cout,), jnp.float32, 0.5, 1.5),
    }

    x = jax.random.normal(keys[15], (N, inplanes, L), jnp.float32)

    out = bottleneck1d(x, params, ks=ks, stride=1)
    out = jax.block_until_ready(out)

    ref = _reference(x, params, ks=ks)
    assert out.shape == ref.shape
    max_err = float(jnp.max(jnp.abs(out - ref)))
    # bf16 matmul operands with f32 accumulation -> relaxed (but tight for these scales) tolerance
    assert jnp.allclose(out, ref, atol=2e-2, rtol=2e-2), max_err

    print("KERNEL_OK")
</pallas_src>

<mosaic_0001>
module attributes {stable_mosaic.version = 11 : i64} {
  func.func @_bottleneck_kernel(%arg0: i32, %arg1: memref<1x32x128xf32, #tpu.memory_space<vmem>>, %arg2: memref<8x32xbf16, #tpu.memory_space<vmem>>, %arg3: memref<8x1xf32, #tpu.memory_space<vmem>>, %arg4: memref<8x24xbf16, #tpu.memory_space<vmem>>, %arg5: memref<8x1xf32, #tpu.memory_space<vmem>>, %arg6: memref<32x8xbf16, #tpu.memory_space<vmem>>, %arg7: memref<32x1xf32, #tpu.memory_space<vmem>>, %arg8: memref<1x32x128xf32, #tpu.memory_space<vmem>>) attributes {dimension_semantics = [#tpu.dimension_semantics<parallel>], iteration_bounds = array<i64: 2>, scalar_prefetch = 0 : i64, scratch_operands = 0 : i64, tpu.core_type = #tpu.core_type<tc>, window_params = [{transform_indices = @transform_0, window_bounds = array<i64: 1, 32, 128>}, {pipeline_mode = #tpu.pipeline_mode<synchronous>, transform_indices = @transform_1, window_bounds = array<i64: 8, 32>}, {pipeline_mode = #tpu.pipeline_mode<synchronous>, transform_indices = @transform_2, window_bounds = array<i64: 8, 1>}, {pipeline_mode = #tpu.pipeline_mode<synchronous>, transform_indices = @transform_3, window_bounds = array<i64: 8, 24>}, {pipeline_mode = #tpu.pipeline_mode<synchronous>, transform_indices = @transform_4, window_bounds = array<i64: 8, 1>}, {pipeline_mode = #tpu.pipeline_mode<synchronous>, transform_indices = @transform_5, window_bounds = array<i64: 32, 8>}, {pipeline_mode = #tpu.pipeline_mode<synchronous>, transform_indices = @transform_6, window_bounds = array<i64: 32, 1>}, {transform_indices = @transform_7, window_bounds = array<i64: 1, 32, 128>}]} {
    %c0 = arith.constant 0 : index
    %c0_0 = arith.constant 0 : index
    %c0_1 = arith.constant 0 : index
    %0 = vector.load %arg1[%c0, %c0_0, %c0_1] : memref<1x32x128xf32, #tpu.memory_space<vmem>>, vector<1x32x128xf32>
    %1 = vector.shape_cast %0 : vector<1x32x128xf32> to vector<32x128xf32>
    %c0_2 = arith.constant 0 : index
    %c0_3 = arith.constant 0 : index
    %2 = vector.load %arg2[%c0_2, %c0_3] : memref<8x32xbf16, #tpu.memory_space<vmem>>, vector<8x32xbf16>
    %3 = arith.truncf %1 : vector<32x128xf32> to vector<32x128xbf16>
    %cst = arith.constant dense<0.000000e+00> : vector<8x128xf32>
    %4 = tpu.matmul %2, %3, %cst {dimension_numbers = #tpu.dot_dimension_numbers<[1], [0], [0], [1], [0, 0, 1, 1], [], []>} : vector<8x32xbf16>, vector<32x128xbf16>, vector<8x128xf32> -> vector<8x128xf32>
    %c0_4 = arith.constant 0 : index
    %c0_5 = arith.constant 0 : index
    %5 = vector.load %arg3[%c0_4, %c0_5] : memref<8x1xf32, #tpu.memory_space<vmem>>, vector<8x1xf32>
    %6 = vector.broadcast %5 : vector<8x1xf32> to vector<8x128xf32>
    %7 = arith.addf %4, %6 : vector<8x128xf32>
    %cst_6 = arith.constant 0.000000e+00 : f32
    %8 = vector.broadcast %cst_6 : f32 to vector<8x128xf32>
    %9 = arith.maximumf %7, %8 : vector<8x128xf32>
    %10 = tpu.iota {dimensions = array<i32: 1>} : vector<8x128xi32>
    %c1_i32 = arith.constant 1 : i32
    %11 = tpu.dynamic_rotate %9 by %c1_i32 dim 1 : vector<8x128xf32>, i32 -> vector<8x128xf32>
    %c1_i32_7 = arith.constant 1 : i32
    %12 = vector.broadcast %c1_i32_7 : i32 to vector<8x128xi32>
    %13 = arith.cmpi sge, %10, %12 : vector<8x128xi32>
    %c129_i32 = arith.constant 129 : i32
    %14 = vector.broadcast %c129_i32 : i32 to vector<8x128xi32>
    %15 = arith.cmpi slt, %10, %14 : vector<8x128xi32>
    %16 = arith.andi %13, %15 : vector<8x128xi1>
    %cst_8 = arith.constant 0.000000e+00 : f32
    %17 = vector.broadcast %cst_8 : f32 to vector<8x128xf32>
    %18 = arith.select %16, %11, %17 : vector<8x128xi1>, vector<8x128xf32>
    %c127_i32 = arith.constant 127 : i32
    %19 = tpu.dynamic_rotate %9 by %c127_i32 dim 1 : vector<8x128xf32>, i32 -> vector<8x128xf32>
    %c-1_i32 = arith.constant -1 : i32
    %20 = vector.broadcast %c-1_i32 : i32 to vector<8x128xi32>
    %21 = arith.cmpi sge, %10, %20 : vector<8x128xi32>
    %c127_i32_9 = arith.constant 127 : i32
    %22 = vector.broadcast %c127_i32_9 : i32 to vector<8x128xi32>
    %23 = arith.cmpi slt, %10, %22 : vector<8x128xi32>
    %24 = arith.andi %21, %23 : vector<8x128xi1>
    %cst_10 = arith.constant 0.000000e+00 : f32
    %25 = vector.broadcast %cst_10 : f32 to vector<8x128xf32>
    %26 = arith.select %24, %19, %25 : vector<8x128xi1>, vector<8x128xf32>
    %27 = tpu.concatenate %18, %9, %26 in 0 : vector<8x128xf32>, vector<8x128xf32>, vector<8x128xf32> -> vector<24x128xf32>
    %28 = arith.truncf %27 : vector<24x128xf32> to vector<24x128xbf16>
    %c0_11 = arith.constant 0 : index
    %c0_12 = arith.constant 0 : index
    %29 = vector.load %arg4[%c0_11, %c0_12] : memref<8x24xbf16, #tpu.memory_space<vmem>>, vector<8x24xbf16>
    %cst_13 = arith.constant dense<0.000000e+00> : vector<8x128xf32>
    %30 = tpu.matmul %29, %28, %cst_13 {dimension_numbers = #tpu.dot_dimension_numbers<[1], [0], [0], [1], [0, 0, 1, 1], [], []>} : vector<8x24xbf16>, vector<24x128xbf16>, vector<8x128xf32> -> vector<8x128xf32>
    %c0_14 = arith.constant 0 : index
    %c0_15 = arith.constant 0 : index
    %31 = vector.load %arg5[%c0_14, %c0_15] : memref<8x1xf32, #tpu.memory_space<vmem>>, vector<8x1xf32>
    %32 = vector.broadcast %31 : vector<8x1xf32> to vector<8x128xf32>
    %33 = arith.addf %30, %32 : vector<8x128xf32>
    %cst_16 = arith.constant 0.000000e+00 : f32
    %34 = vector.broadcast %cst_16 : f32 to vector<8x128xf32>
    %35 = arith.maximumf %33, %34 : vector<8x128xf32>
    %c0_17 = arith.constant 0 : index
    %c0_18 = arith.constant 0 : index
    %36 = vector.load %arg6[%c0_17, %c0_18] : memref<32x8xbf16, #tpu.memory_space<vmem>>, vector<32x8xbf16>
    %37 = arith.truncf %35 : vector<8x128xf32> to vector<8x128xbf16>
    %cst_19 = arith.constant dense<0.000000e+00> : vector<32x128xf32>
    %38 = tpu.matmul %36, %37, %cst_19 {dimension_numbers = #tpu.dot_dimension_numbers<[1], [0], [0], [1], [0, 0, 1, 1], [], []>} : vector<32x8xbf16>, vector<8x128xbf16>, vector<32x128xf32> -> vector<32x128xf32>
    %c0_20 = arith.constant 0 : index
    %c0_21 = arith.constant 0 : index
    %39 = vector.load %arg7[%c0_20, %c0_21] : memref<32x1xf32, #tpu.memory_space<vmem>>, vector<32x1xf32>
    %40 = vector.broadcast %39 : vector<32x1xf32> to vector<32x128xf32>
    %41 = arith.addf %38, %40 : vector<32x128xf32>
    %42 = arith.addf %41, %1 : vector<32x128xf32>
    %cst_22 = arith.constant 0.000000e+00 : f32
    %43 = vector.broadcast %cst_22 : f32 to vector<32x128xf32>
    %44 = arith.maximumf %42, %43 : vector<32x128xf32>
    %c0_23 = arith.constant 0 : index
    %c0_24 = arith.constant 0 : index
    %c0_25 = arith.constant 0 : index
    %45 = vector.load %arg8[%c0_23, %c0_24, %c0_25] : memref<1x32x128xf32, #tpu.memory_space<vmem>>, vector<1x32x128xf32>
    %46 = vector.shape_cast %45 : vector<1x32x128xf32> to vector<32x128xf32>
    %47 = vector.shape_cast %44 : vector<32x128xf32> to vector<1x32x128xf32>
    tpu.vector_store %arg8[%c0_23, %c0_24, %c0_25], %47 {strides = array<i32>} : memref<1x32x128xf32, #tpu.memory_space<vmem>>, vector<1x32x128xf32>,
    return
  }
  func.func @transform_0(%arg0: i32) -> (i32, i32, i32) {
    %c0_i32 = arith.constant 0 : i32
    %c0_i32_0 = arith.constant 0 : i32
    %c0_i32_1 = arith.constant 0 : i32
    return %arg0, %c0_i32, %c0_i32_0 : i32, i32, i32
  }
  func.func @transform_1(%arg0: i32) -> (i32, i32) {
    %c0_i32 = arith.constant 0 : i32
    %c0_i32_0 = arith.constant 0 : i32
    %c0_i32_1 = arith.constant 0 : i32
    return %c0_i32, %c0_i32_0 : i32, i32
  }
  func.func @transform_2(%arg0: i32) -> (i32, i32) {
    %c0_i32 = arith.constant 0 : i32
    %c0_i32_0 = arith.constant 0 : i32
    %c0_i32_1 = arith.constant 0 : i32
    return %c0_i32, %c0_i32_0 : i32, i32
  }
  func.func @transform_3(%arg0: i32) -> (i32, i32) {
    %c0_i32 = arith.constant 0 : i32
    %c0_i32_0 = arith.constant 0 : i32
    %c0_i32_1 = arith.constant 0 : i32
    return %c0_i32, %c0_i32_0 : i32, i32
  }
  func.func @transform_4(%arg0: i32) -> (i32, i32) {
    %c0_i32 = arith.constant 0 : i32
    %c0_i32_0 = arith.constant 0 : i32
    %c0_i32_1 = arith.constant 0 : i32
    return %c0_i32, %c0_i32_0 : i32, i32
  }
  func.func @transform_5(%arg0: i32) -> (i32, i32) {
    %c0_i32 = arith.constant 0 : i32
    %c0_i32_0 = arith.constant 0 : i32
    %c0_i32_1 = arith.constant 0 : i32
    return %c0_i32, %c0_i32_0 : i32, i32
  }
  func.func @transform_6(%arg0: i32) -> (i32, i32) {
    %c0_i32 = arith.constant 0 : i32
    %c0_i32_0 = arith.constant 0 : i32
    %c0_i32_1 = arith.constant 0 : i32
    return %c0_i32, %c0_i32_0 : i32, i32
  }
  func.func @transform_7(%arg0: i32) -> (i32, i32, i32) {
    %c0_i32 = arith.constant 0 : i32
    %c0_i32_0 = arith.constant 0 : i32
    %c0_i32_1 = arith.constant 0 : i32
    return %arg0, %c0_i32, %c0_i32_0 : i32, i32, i32
  }
}

</mosaic_0001>

<bundles_post_ra>
// kernel: tpu_custom_call.1
= control target key start
LH: loop header
LB: loop body
LE: loop exit
PB: predicated region body
PF: predicated region fallthrough
CT: control target
= control target key end

     0   :  { %12 = vsyncpa [#allocation3], 0  ;;  %s961_s0 = inlined_call_operand.hbm [shape: f32[2,32,128], index: 0, kind: input, shape index: {}]   ;;  %s962_s1 = inlined_call_operand.vmem [shape: bf16[8,32], index: 1, kind: input, shape index: {}]   ;;  %s963_s2 = inlined_call_operand.vmem [shape: f32[8,1], index: 2, kind: input, shape index: {}]   ;;  %s964_s3 = inlined_call_operand.vmem [shape: bf16[8,24], index: 3, kind: input, shape index: {}]   ;;  %s965_s4 = inlined_call_operand.vmem [shape: f32[8,1], index: 4, kind: input, shape index: {}]   ;;  %s966_s5 = inlined_call_operand.vmem [shape: bf16[32,8], index: 5, kind: input, shape index: {}]   ;;  %s967_s6 = inlined_call_operand.vmem [shape: f32[32,1], index: 6, kind: input, shape index: {}]   ;;  %s968_s7 = inlined_call_operand.hbm [shape: f32[2,32,128], index: 7, kind: output, shape index: {}]  }
   0x1   :  { %14 = vsyncpa [#allocation3 + $0x1], 0 }
   0x2   :  { %15 = vsyncpa [#allocation4], 0 }
   0x3   :  { %17 = vsyncpa [#allocation4 + $0x1], 0  ;;  %s782_s24 = smov 0   ;;  %s784_s25 = smov 0  }
   0x4   :  { %s786_s26 = smov 0   ;;  %s788_s27 = smov 0  }
   0x5 LB: > { %s803_s28 = sadd.s32 4294967295, %s732_s27   ;;  %s545_s29 = sadd.s32 4294967294, %s732_s27   ;;  %s732_s27 = sphi %s788_s27, %s980_s27   ;;  %s728_s26 = sphi %s786_s26, %s979_s26   ;;  %s724_s25 = sphi %s784_s25, %s978_s25   ;;  %s720_s24 = sphi %s782_s24, %s977_s24  }
   0x6   : > { %s807_s30 = sadd.s32 1, %s732_s27   ;;  %s30_s8 = sadd.s32 1, %s728_s26 }
   0x7   : > { %s27_s9 = ssub.s32 %s732_s27, %s807_s30  ;;  %p37_p0 = scmp.ne.s32.totalorder %s728_s26, %s724_s25 }
   0x8   : > { %p28_p1 = scmp.eq.s32.totalorder %s27_s9, 0  ;;  %p38_p2 = scmp.eq.s32.totalorder %s732_s27, 0 }
   0x9   : > { %p43_p3 = scmp.ne.s32.totalorder %s724_s25, %s720_s24  ;;  %p44_p4 = scmp.eq.s32.totalorder %s803_s28, 0 }
   0xa   : > { %s819_s10 = scalar_select %p28_p1, %s728_s26, %s30_s8  }
   0xb   : > { %p821_p5 = por %p38_p2, %p37_p0  ;;  %p825_p6 = por %p44_p4, %p43_p3 }
   0xc   : > { %969 = sst [smem:[#allocation8_spill]] %s819_s10  ;;  %p193_p7 = scmp.eq.s32.totalorder %s803_s28, 1 }
   0xd   : > { %p199_p8 = scmp.eq.s32.totalorder %s545_s29, 1  ;;  %p591_p10 = scmp.lt.s32.totalorder %s732_s27, 2 }
   0xe   : > { %p832_p11 = por %p193_p7, %p37_p0  ;;  %s237_s15 = sand.u32 1, %s728_s26  }
   0xf   : > { %p836_p12 = por %p199_p8, %p43_p3  ;;  %s574_s16 = sshll.u32 %s732_s27, 5 }
  0x10   : > { %s548_s17 = sshll.u32 %s237_s15, 5  ;;  %s246_s20 = scalar_lea.hbm %s961_s0, %s574_s16 }
  0x11   : > { %s247_s21 = sshll.u32 %s246_s20, 4  ;;  %s241_s22 = scalar_lea.vmem [#allocation2], %s548_s17  ;;  %s248_s21 = int_to_ptr.hbm [resolvable:$true] %s247_s21 }
  0x12   : > { %s249_s23 = sshll.u32 %s241_s22, 4  ;;  %p847_p13 = pnand %p591_p10, %p821_p5  ;;  %s250_s23 = int_to_ptr.vmem [resolvable:$true] %s249_s23 }
  0x13   : > { %p551_p0 = scmp.ge.s32.totalorder %s732_s27, 1  ;;  %p257_p1 = scmp.lt.s32.totalorder %s732_s27, 3 }
  0x14   : > { %s238_s8 = scalar_lea.sflag [#allocation3], %s237_s15  ;;  %s636_s9 = sshra.s32 %s248_s21, 4  ;;  %s637_s9 = int_to_ptr.hbm [resolvable:$true] %s636_s9 }
  0x15   : > { %s638_s10 = scalar_lea.hbm %s637_s9, 32  ;;  %p640_p3 = pneg %p847_p13 }
  0x16   : > { %p639_p2 = scmp.ne.s32.totalorder %s637_s9, %s638_s10  ;;  %s643_s11 = scalar_lea.hbm %s961_s0, 64 }
  0x17   : > { %p644_p5 = scmp.lt.s32.totalorder %s637_s9, %s961_s0  ;;  %p645_p8 = scmp.lt.s32.totalorder %s643_s11, %s638_s10 }
  0x18   : > { %p641_p4 = pnand %p640_p3, %p639_p2 }
  0x19   : > { %p646_p10 = por %p645_p8, %p644_p5 }
  0x1a   : > { %p642_p7 = pneg %p641_p4 }
  0x1c   : > { %p647_p9 = pnand %p646_p10, %p642_p7 }
  0x1e   : > { %650 = shalt.err (!%p647_p9)
}
  0x1f   : > { %s734_s15 = smov 128   ;;  %s735_s20 = smov 8  }
  0x20   : > { %586 = dma.hbm_to_vmem [thread:$0]  (!%p847_p13), %s248_s21, 512, %s250_s23, %s238_s8, %s734_s15, %s734_s15, %s735_s20  }
  0x21   : > { %p258_p2 = pnand %p551_p0, %p257_p1 }
  0x22   : > { %s868_s22 = sand.u32 (!%p258_p2), 1, %s724_s25  }
  0x23   : > { %261 = sbr.rel (%p258_p2) target bundleno = 594 (0x252), region = 48  ;;  %s552_s10 = sshll.u32 (!%p258_p2), %s868_s22, 5 }
  0x24   : > { %s264_s9 = scalar_lea.sflag (!%p258_p2), [#allocation3], %s868_s22  ;;  %s267_s16 = scalar_lea.vmem (!%p258_p2), [#allocation2], %s552_s10 }
  0x28   : > { %711 = dma.done.wait (%p825_p6), %s264_s9, 512  }
  0x29   : > { %713 = vsyncadd (%p825_p6), %s264_s9, 4294966784  ;;  %v736_v0 = vmov 0   ;;  %v878_v1 = vld [vmem:[%s267_s16 + $0x10] sm:$0xff]  ;;  %v880_v2 = vld [vmem:[%s267_s16 + $0x18] sm:$0xff]  ;;  %vm313_vm0 = vcmask 261120   ;;  %s737_s8 = smov 1   ;;  %v331_v17 = vlaneseq }
  0x2a   : > { %633 = vset.pattern.permute.xlu0 %v736_v0  ;;  %634 = vset.pattern.permute.xlu1 %v736_v0  ;;  %v882_v3 = vld [vmem:[%s267_s16] sm:$0xff]  ;;  %v306_v4 = vpack.c.bf16 %v880_v2, %v878_v1  ;;  %v886_v5 = vld [vmem:[%s267_s16 + $0x8] sm:$0xff]  ;;  %s738_s17 = smov 127   ;;  %v383_v14 = vld [vmem:[%s967_s6 + $0x10] sm:$0xff]  ;;  %vm358_vm2 = vcmask 1043456   ;;  %vm739_vm4 = vmmov 1  }
  0x2b   : > { %635 = vset.pattern.permute.xlu2 %v736_v0  ;;  %v307_v6 = vld [vmem:[%s963_s2] sm:$0xff]  ;;  %v305_v7 = vpack.c.bf16 %v886_v5, %v882_v3  ;;  %v384_v16 = vld [vmem:[%s967_s6 + $0x18] sm:$0xff]  ;;  %v332_v18 = vand.u32 127, %v331_v17  ;;  %vm354_vm6 = vcmask 195584   ;;  %v382_v27 = vld [vmem:[%s967_s6 + $0x8] sm:$0xff]  ;;  %vm415_vm7 = vcmask 64512  }
  0x2c   : > { %310 = vperm.xlu0 %633, %v307_v6   ;;  %323 = vmatpush.bf16.msra.mxu0 %v306_v4  ;;  %v304_v8 = vld [vmem:[%s962_s1] sm:$0xf]  ;;  %v576_v35 = vld [vmem:[%s966_s5 + $0x8] sm:$0xff]  ;;  %s577_s15 = sshll.u32 %s803_s28, 5  ;;  %s298_s20 = scalar_lea.vmem [#allocation5], %s552_s10 }
  0x2d   : > { %v348_v15 = vld [vmem:[%s965_s4] sm:$0xff]  ;;  %vm342_vm1 = vcmp.lt.s32.totalorder %v332_v18, 127  ;;  %vm335_vm3 = vcmp.ge.s32.totalorder %v332_v18, 1  ;;  %s468_s21 = scalar_lea.hbm %s968_s7, %s577_s15  ;;  %s469_s23 = sshll.u32 %s298_s20, 4  ;;  %s470_s23 = int_to_ptr.vmem [resolvable:$true] %s469_s23 }
  0x2e   : > { %vm555_vm5 = vmpackc.low %vm739_vm4, %vm335_vm3  ;;  %v347_v25 = vld [vmem:[%s964_s3] sm:$0xf]  ;;  %s471_s28 = sshll.u32 %s468_s21, 4  ;;  %s457_s10 = scalar_lea.sflag [#allocation4], %s868_s22  ;;  %s472_s28 = int_to_ptr.hbm [resolvable:$true] %s471_s28 }
  0x2f   : > { %v381_v26 = vld [vmem:[%s967_s6] sm:$0xff]  ;;  %s680_s12 = sshra.s32 %s472_s28, 4  ;;  %s686_s11 = scalar_lea.hbm %s968_s7, 64  ;;  %s681_s12 = int_to_ptr.hbm [resolvable:$true] %s680_s12 }
  0x30   : > { %324 = vmatpush.bf16.msra.mxu0 %v305_v7  ;;  %387 = vperm.xlu2 %635, %v381_v26   ;;  %v575_v34 = vld [vmem:[%s966_s5] sm:$0xff]  ;;  %s682_s29 = scalar_lea.hbm %s681_s12, 32  ;;  %p687_p0 = scmp.lt.s32.totalorder %s681_s12, %s968_s7 }
  0x31   : > { %p683_p6 = scmp.ne.s32.totalorder %s681_s12, %s682_s29  ;;  %p688_p1 = scmp.lt.s32.totalorder %s686_s11, %s682_s29 }
  0x33   : > { %554 = vmatmul.msk.bf16.vlgmr.msra.gmra.mxu0 %vm313_vm0, %v304_v8  ;;  %p684_p9 = pnand %p683_p6, %p832_p11  ;;  %p689_p3 = por %p688_p1, %p687_p0 }
  0x35   : > { %p685_p13 = pneg %p684_p9 }
  0x37   : > { %p690_p4 = pnand %p689_p3, %p685_p13 }
  0x38   : > { %392 = vperm.xlu2 %635, %v382_v27  }
  0x8a   : > { %v388_v37 = vpop.permute.xlu2 %387 }
  0x92   : > { %v393_v48 = vpop.permute.xlu2 %392 }
  0x9e   : > { %v311_v9 = vpop.permute.xlu0 %310 }
  0xb0   : > { %v326_v10 = vpop.f32.mrf.mxu0 }
  0xb1   : > { %v327_v11 = vadd.f32 %v326_v10, %v311_v9 }
  0xb3   : > { %v330_v12 = vmax.f32 %v327_v11, 0.0 }
  0xb5   : > { %333 = vrot.lane.b32.xlu1 %v330_v12, %s737_s8  ;;  %339 = vrot.lane.b32.xlu0 %v330_v12, %s738_s17 }
  0xb8   : > { %v328_v13 = vpop.f32.mrf.mxu0 }
  0xbd   : > { %397 = vperm.xlu0 %633, %v383_v14   ;;  %351 = vperm.xlu1 %634, %v348_v15  }
  0xc5   : > { %402 = vperm.xlu1 %634, %v384_v16  }
 0x127   : > { %v340_v19 = vpop.permute.xlu0 %339  ;;  %v334_v22 = vpop.permute.xlu1 %333 }
 0x128   : > { %v344_v20 = vsel %vm342_vm1, %v340_v19, 0.0  ;;  %v556_v24 = vpack.c.bf16 %v330_v12, %v334_v22 }
 0x129   : > { %v346_v21 = vpack.c.bf16 %v344_v20, %v344_v20 }
 0x12b   : > { %v360_v23 = vsel %vm358_vm2, %v346_v21, 0 }
 0x12c   : > { %368 = vmatpush.bf16.msra.mxu1 %v360_v23 }
 0x12f   : > { %v352_v28 = vpop.permute.xlu1 %351  ;;  %v398_v38 = vpop.permute.xlu0 %397 }
 0x130   : > { %557 = vmatpush.bf16.msk.msra.mxu1 %vm555_vm5, %v556_v24 }
 0x133   : > { %558 = vmatmul.msk.bf16.vlgmr.msra.gmra.mxu1 %vm354_vm6, %v347_v25 }
 0x137   : > { %v403_v47 = vpop.permute.xlu1 %402 }
 0x1b0   : > { %v371_v29 = vpop.f32.mrf.mxu1 }
 0x1b1   : > { %v372_v30 = vadd.f32 %v371_v29, %v352_v28 }
 0x1b3   : > { %v375_v31 = vmax.f32 %v372_v30, 0.0 }
 0x1b5   : > { %v380_v32 = vpack.c.bf16 %v375_v31, %v375_v31 }
 0x1b7   : > { %v423_v33 = vsel %vm358_vm2, %v380_v32, 0 }
 0x1b8   : > { %v373_v36 = vpop.f32.mrf.mxu1  ;;  %432 = vmatpush.bf16.msra.mxu2 %v423_v33  ;;  %578 = vmatpush.bf16.msra.mxu3 %v423_v33 }
 0x1bb   : > { %567 = vmatmul.msk.bf16.vlgmr.msra.gmra.mxu2 %vm415_vm7, %v575_v34  ;;  %568 = vmatmul.msk.bf16.vlgmr.msra.gmra.mxu3 %vm415_vm7, %v576_v35 }
 0x23e   : > { %v434_v39 = vpop.f32.mrf.mxu2  ;;  %v439_v40 = vpop.f32.mrf.mxu3 }
 0x23f   : > { %v435_v41 = vadd.f32 %v434_v39, %v388_v37  ;;  %v440_v42 = vadd.f32 %v439_v40, %v398_v38 }
 0x241   : > { %v444_v43 = vadd.f32 %v435_v41, %v882_v3  ;;  %v446_v44 = vadd.f32 %v440_v42, %v878_v1 }
 0x243   : > { %v448_v45 = vmax.f32 %v444_v43, 0.0  ;;  %v450_v46 = vmax.f32 %v446_v44, 0.0 }
 0x245   : > { %452 = vst [vmem:[%s298_s20] sm:$0xff] %v448_v45 }
 0x246   : > { %454 = vst [vmem:[%s298_s20 + $0x10] sm:$0xff] %v450_v46  ;;  %v436_v49 = vpop.f32.mrf.mxu2  ;;  %v441_v50 = vpop.f32.mrf.mxu3 }
 0x247   : > { %v437_v51 = vadd.f32 %v436_v49, %v393_v48  ;;  %v442_v52 = vadd.f32 %v441_v50, %v403_v47 }
 0x249   : > { %v445_v53 = vadd.f32 %v437_v51, %v886_v5  ;;  %v447_v54 = vadd.f32 %v442_v52, %v880_v2 }
 0x24b   : > { %v449_v55 = vmax.f32 %v445_v53, 0.0  ;;  %v451_v56 = vmax.f32 %v447_v54, 0.0 }
 0x24d   : > { %453 = vst [vmem:[%s298_s20 + $0x8] sm:$0xff] %v449_v55 }
 0x24e   : > { %455 = vst [vmem:[%s298_s20 + $0x18] sm:$0xff] %v451_v56 }
 0x24f   : > { %693 = shalt.err (!%p690_p4)
}
 0x250   : > { %s740_s22 = smov 128   ;;  %s741_s15 = smov 8  }
 0x251   : > { %581 = dma.vmem_to_hbm [thread:$0]  (%p832_p11), %s470_s23, 512, %s472_s28, %s457_s10, %s740_s22, %s740_s22, %s741_s15  }
 0x252 PF: > { %s486_s20 = sand.u32 1, %s720_s24   ;;  %p975_p7 = scmp.ge.s32.totalorder %s732_s27, 2 }
 0x253   : > { %s487_s9 = scalar_lea.sflag [#allocation4], %s486_s20 }
 0x254   : > { %p588_p5 = pnand %p975_p7, %p836_p12 }
 0x256   : > { %p589_p8 = pneg %p588_p5 }
 0x258   : > { %715 = dma.done.wait (%p589_p8), %s487_s9, 512  }
 0x259   : > { %717 = vsyncadd (%p589_p8), %s487_s9, 4294966784  ;;  %s976_s16 = sld [smem:[#allocation8_spill]]  ;;  %p20_p10 = scmp.ge.s32.totalorder %s807_s30, 4  }
 0x25a   : > { %s977_s24 = smov %s724_s25  ;;  %s978_s25 = smov %s728_s26 }
 0x25b   : > { %s980_s27 = smov %s807_s30  ;;  %22 = sbr.rel (!%p20_p10) target bundleno = 5 (0x5), region = 93 }
 0x25f   : > { %s979_s26 = smov %s976_s16 }
 0x260   :  { %493 = vsyncpa [#allocation3], 1 }
 0x261   :  { %495 = vsyncpa [#allocation3 + $0x1], 1 }
 0x262   :  { %496 = vsyncpa [#allocation4], 1 }
 0x263   :  { %498 = vsyncpa [#allocation4 + $0x1], 1 }

</bundles_post_ra>
